<compile_context>
chip_gen: v5e
topology: v5e:2x2
jax: 0.10.0
libtpu: 0.0.40
codegen_flags: <defaults>
</compile_context>

<pallas_src>
import jax
import jax.numpy as jnp
from jax.experimental import pallas as pl
from jax.experimental.pallas import tpu as pltpu


def _make_kernel(num_layers, dil1, dil2, T, F):
    """Build the per-batch-element kernel with static dilations."""

    def kernel(x_ref, w_in_ref, b_in_ref, wm_ref, bm_ref, w_out_ref, b_out_ref,
               o_ref):
        # Lane-index iota, reused to zero the wrapped columns after pltpu.roll.
        iota_t = jax.lax.broadcasted_iota(jnp.int32, (F, T), 1)

        def shift(a, d):
            # Zero-filled time shift: out[:, t] = a[:, t - d] (0 if out of range).
            if d == 0:
                return a
            if abs(d) >= T:
                return jnp.zeros_like(a)
            rolled = pltpu.roll(a, shift=d % T, axis=1)  # XLU lane rotate (wraps)
            if d > 0:
                return jnp.where(iota_t < d, 0.0, rolled)
            return jnp.where(iota_t >= T + d, 0.0, rolled)

        x = x_ref[0]  # (dim, T) bf16

        # conv_1x1_in : (F, dim) @ (dim, T) with f32 accumulation.
        f = (jnp.dot(w_in_ref[...], x, preferred_element_type=jnp.float32)
             + b_in_ref[...])                                  # (F, T) f32

        for i in range(num_layers):
            f_in = f
            d1, d2 = dil1[i], dil2[i]
            # Stack the 5 shifted views; one (F,5F)x(5F,T) matmul replaces the
            # layer's 7 tiny matmuls (2 dilated k=3 convs + fusion 1x1).
            S = jnp.concatenate(
                [shift(f, d1), shift(f, -d1), f, shift(f, d2), shift(f, -d2)],
                axis=0)                                        # (5F, T) f32
            g = (jnp.dot(wm_ref[i], S.astype(jnp.bfloat16),
                         preferred_element_type=jnp.float32)
                 + bm_ref[i])                                  # (F, T) f32
            g = jnp.maximum(g, 0.0)                            # ReLU in f32
            # TODO(synk): nn.Dropout is identity at inference; training-mode dropout not modeled.
            f = g + f_in

        out = (jnp.dot(w_out_ref[...], f.astype(jnp.bfloat16),
                       preferred_element_type=jnp.float32)
               + b_out_ref[...])                               # (C_pad, T) f32
        o_ref[0] = out.astype(o_ref.dtype)

    return kernel


def prediction_generation_pallas(x, params, num_layers):
    """x: (B, dim, T) float32; params in PyTorch Conv1d layout (Cout, Cin, K)."""
    B, dim, T = x.shape
    F_ = params["w_in"].shape[0]
    C = params["w_out"].shape[0]
    C_pad = ((C + 7) // 8) * 8
    dil1 = tuple(2 ** (num_layers - 1 - i) for i in range(num_layers))
    dil2 = tuple(2 ** i for i in range(num_layers))

    f32, bf16 = jnp.float32, jnp.bfloat16

    # ---- repack / pre-merge weights in the wrapper (all ops before ReLU are linear) ----
    w_in = params["w_in"][:, :, 0].astype(bf16)           # (F, dim)
    b_in = params["b_in"][:, None].astype(f32)            # (F, 1)

    wd1 = params["wd1"].astype(f32)                       # (L, F, F, 3)
    wd2 = params["wd2"].astype(f32)                       # (L, F, F, 3)
    wf = params["wf"][:, :, :, 0].astype(f32)             # (L, F, 2F)
    wf_a, wf_b = wf[:, :, :F_], wf[:, :, F_:]

    mm = lambda a, b: jnp.einsum("lij,ljk->lik", a, b)
    # Column-block order must match S = [f<<+d1, f<<-d1, f, f<<+d2, f<<-d2].
    w_merged = jnp.concatenate(
        [mm(wf_a, wd1[..., 0]),                                  # shift(f, +d1)
         mm(wf_a, wd1[..., 2]),                                  # shift(f, -d1)
         mm(wf_a, wd1[..., 1]) + mm(wf_b, wd2[..., 1]),          # f
         mm(wf_b, wd2[..., 0]),                                  # shift(f, +d2)
         mm(wf_b, wd2[..., 2])],                                 # shift(f, -d2)
        axis=2).astype(bf16)                                     # (L, F, 5F)
    b_merged = (jnp.einsum("lij,lj->li", wf_a, params["bd1"])
                + jnp.einsum("lij,lj->li", wf_b, params["bd2"])
                + params["bf"])[:, :, None].astype(f32)          # (L, F, 1)

    # Zero-pad output channels to a sublane multiple -> unmasked lane-dense stores.
    w_out_p = (jnp.zeros((C_pad, F_), f32)
               .at[:C].set(params["w_out"][:, :, 0]).astype(bf16))   # (C_pad, F)
    b_out_p = jnp.zeros((C_pad, 1), f32).at[:C, 0].set(params["b_out"])

    x_bf = x.astype(bf16)  # halves input DMA bytes; f32 accumulation in-kernel

    def full_spec(arr):
        nd = arr.ndim
        return pl.BlockSpec(arr.shape, lambda b, _nd=nd: (0,) * _nd)

    kernel = _make_kernel(num_layers, dil1, dil2, T, F_)

    out_p = pl.pallas_call(
        kernel,
        out_shape=jax.ShapeDtypeStruct((B, C_pad, T), jnp.float32),
        grid=(B,),
        in_specs=[
            pl.BlockSpec((1, dim, T), lambda b: (b, 0, 0)),
            full_spec(w_in), full_spec(b_in),
            full_spec(w_merged), full_spec(b_merged),
            full_spec(w_out_p), full_spec(b_out_p),
        ],
        out_specs=pl.BlockSpec((1, C_pad, T), lambda b: (b, 0, 0)),
        compiler_params=pltpu.CompilerParams(
            dimension_semantics=("parallel",)),  # megacore sharding on v7x
        # TODO(synk): for production MS-TCN++ sizes (dim~2048, T in the thousands) add a
        # T grid axis with per-layer dilation halo and set vmem_limit_bytes for v7x (64 MiB VMEM).
    )(x_bf, w_in, b_in, w_merged, b_merged, w_out_p, b_out_p)

    return out_p[:, :C, :]


# --------------------------- pure-JAX reference ---------------------------

def _conv1d_ref(x, w, b, dilation=1, padding=0):
    out = jax.lax.conv_general_dilated(
        x, w, window_strides=(1,), padding=[(padding, padding)],
        rhs_dilation=(dilation,), dimension_numbers=("NCH", "OIH", "NCH"))
    return out + b[None, :, None]


def prediction_generation_ref(x, params, num_layers):
    f = _conv1d_ref(x, params["w_in"], params["b_in"])
    for i in range(num_layers):
        d_a = 2 ** (num_layers - 1 - i)
        d_b = 2 ** i
        f_in = f
        a = _conv1d_ref(f, params["wd1"][i], params["bd1"][i], dilation=d_a, padding=d_a)
        c = _conv1d_ref(f, params["wd2"][i], params["bd2"][i], dilation=d_b, padding=d_b)
        f = _conv1d_ref(jnp.concatenate([a, c], axis=1), params["wf"][i], params["bf"][i])
        f = jax.nn.relu(f)
        f = f + f_in  # dropout = identity (eval)
    return _conv1d_ref(f, params["w_out"], params["b_out"])


# ------------------------------- main -------------------------------------

if __name__ == "__main__":
    num_layers = 4
    num_f_maps = 8
    dim = 8
    num_classes = 6
    B, T = 2, 128

    key = jax.random.PRNGKey(0)
    keys = jax.random.split(key, 12)
    scale = 0.1

    params = {
        "w_in":  scale * jax.random.normal(keys[0], (num_f_maps, dim, 1), jnp.float32),
        "b_in":  scale * jax.random.normal(keys[1], (num_f_maps,), jnp.float32),
        "wd1":   scale * jax.random.normal(keys[2], (num_layers, num_f_maps, num_f_maps, 3), jnp.float32),
        "bd1":   scale * jax.random.normal(keys[3], (num_layers, num_f_maps), jnp.float32),
        "wd2":   scale * jax.random.normal(keys[4], (num_layers, num_f_maps, num_f_maps, 3), jnp.float32),
        "bd2":   scale * jax.random.normal(keys[5], (num_layers, num_f_maps), jnp.float32),
        "wf":    scale * jax.random.normal(keys[6], (num_layers, num_f_maps, 2 * num_f_maps, 1), jnp.float32),
        "bf":    scale * jax.random.normal(keys[7], (num_layers, num_f_maps), jnp.float32),
        "w_out": scale * jax.random.normal(keys[8], (num_classes, num_f_maps, 1), jnp.float32),
        "b_out": scale * jax.random.normal(keys[9], (num_classes,), jnp.float32),
    }

    x = jax.random.normal(keys[10], (B, dim, T), jnp.float32)

    out = prediction_generation_pallas(x, params, num_layers)
    out = jax.block_until_ready(out)

    ref = prediction_generation_ref(x, params, num_layers)
    ref = jax.block_until_ready(ref)

    assert out.shape == (B, num_classes, T)
    # bf16 matmul operands (f32 accumulation) -> relaxed tolerance vs. f32 reference.
    max_err = jnp.max(jnp.abs(out - ref))
    assert jnp.allclose(out, ref, atol=2e-2, rtol=2e-2), f"max abs err = {max_err}"

    print("KERNEL_OK")
</pallas_src>

<mosaic_0001>
module attributes {stable_mosaic.version = 11 : i64} {
  func.func @kernel(%arg0: i32, %arg1: memref<1x8x128xbf16, #tpu.memory_space<vmem>>, %arg2: memref<8x8xbf16, #tpu.memory_space<vmem>>, %arg3: memref<8x1xf32, #tpu.memory_space<vmem>>, %arg4: memref<4x8x40xbf16, #tpu.memory_space<vmem>>, %arg5: memref<4x8x1xf32, #tpu.memory_space<vmem>>, %arg6: memref<8x8xbf16, #tpu.memory_space<vmem>>, %arg7: memref<8x1xf32, #tpu.memory_space<vmem>>, %arg8: memref<1x8x128xf32, #tpu.memory_space<vmem>>) attributes {dimension_semantics = [#tpu.dimension_semantics<parallel>], iteration_bounds = array<i64: 2>, scalar_prefetch = 0 : i64, scratch_operands = 0 : i64, tpu.core_type = #tpu.core_type<tc>, window_params = [{transform_indices = @transform_0, window_bounds = array<i64: 1, 8, 128>}, {pipeline_mode = #tpu.pipeline_mode<synchronous>, transform_indices = @transform_1, window_bounds = array<i64: 8, 8>}, {pipeline_mode = #tpu.pipeline_mode<synchronous>, transform_indices = @transform_2, window_bounds = array<i64: 8, 1>}, {pipeline_mode = #tpu.pipeline_mode<synchronous>, transform_indices = @transform_3, window_bounds = array<i64: 4, 8, 40>}, {pipeline_mode = #tpu.pipeline_mode<synchronous>, transform_indices = @transform_4, window_bounds = array<i64: 4, 8, 1>}, {pipeline_mode = #tpu.pipeline_mode<synchronous>, transform_indices = @transform_5, window_bounds = array<i64: 8, 8>}, {pipeline_mode = #tpu.pipeline_mode<synchronous>, transform_indices = @transform_6, window_bounds = array<i64: 8, 1>}, {transform_indices = @transform_7, window_bounds = array<i64: 1, 8, 128>}]} {
    %0 = tpu.iota {dimensions = array<i32: 1>} : vector<8x128xi32>
    %c0 = arith.constant 0 : index
    %c0_0 = arith.constant 0 : index
    %c0_1 = arith.constant 0 : index
    %1 = vector.load %arg1[%c0, %c0_0, %c0_1] : memref<1x8x128xbf16, #tpu.memory_space<vmem>>, vector<1x8x128xbf16>
    %2 = vector.shape_cast %1 : vector<1x8x128xbf16> to vector<8x128xbf16>
    %c0_2 = arith.constant 0 : index
    %c0_3 = arith.constant 0 : index
    %3 = vector.load %arg2[%c0_2, %c0_3] : memref<8x8xbf16, #tpu.memory_space<vmem>>, vector<8x8xbf16>
    %cst = arith.constant dense<0.000000e+00> : vector<8x128xf32>
    %4 = tpu.matmul %3, %2, %cst {dimension_numbers = #tpu.dot_dimension_numbers<[1], [0], [0], [1], [0, 0, 1, 1], [], []>} : vector<8x8xbf16>, vector<8x128xbf16>, vector<8x128xf32> -> vector<8x128xf32>
    %c0_4 = arith.constant 0 : index
    %c0_5 = arith.constant 0 : index
    %5 = vector.load %arg3[%c0_4, %c0_5] : memref<8x1xf32, #tpu.memory_space<vmem>>, vector<8x1xf32>
    %6 = vector.broadcast %5 : vector<8x1xf32> to vector<8x128xf32>
    %7 = arith.addf %4, %6 : vector<8x128xf32>
    %c8_i32 = arith.constant 8 : i32
    %8 = tpu.dynamic_rotate %7 by %c8_i32 dim 1 : vector<8x128xf32>, i32 -> vector<8x128xf32>
    %c8_i32_6 = arith.constant 8 : i32
    %9 = vector.broadcast %c8_i32_6 : i32 to vector<8x128xi32>
    %10 = arith.cmpi slt, %0, %9 : vector<8x128xi32>
    %cst_7 = arith.constant 0.000000e+00 : f32
    %11 = vector.broadcast %cst_7 : f32 to vector<8x128xf32>
    %12 = arith.select %10, %11, %8 : vector<8x128xi1>, vector<8x128xf32>
    %c120_i32 = arith.constant 120 : i32
    %13 = tpu.dynamic_rotate %7 by %c120_i32 dim 1 : vector<8x128xf32>, i32 -> vector<8x128xf32>
    %c120_i32_8 = arith.constant 120 : i32
    %14 = vector.broadcast %c120_i32_8 : i32 to vector<8x128xi32>
    %15 = arith.cmpi sge, %0, %14 : vector<8x128xi32>
    %cst_9 = arith.constant 0.000000e+00 : f32
    %16 = vector.broadcast %cst_9 : f32 to vector<8x128xf32>
    %17 = arith.select %15, %16, %13 : vector<8x128xi1>, vector<8x128xf32>
    %c1_i32 = arith.constant 1 : i32
    %18 = tpu.dynamic_rotate %7 by %c1_i32 dim 1 : vector<8x128xf32>, i32 -> vector<8x128xf32>
    %c1_i32_10 = arith.constant 1 : i32
    %19 = vector.broadcast %c1_i32_10 : i32 to vector<8x128xi32>
    %20 = arith.cmpi slt, %0, %19 : vector<8x128xi32>
    %cst_11 = arith.constant 0.000000e+00 : f32
    %21 = vector.broadcast %cst_11 : f32 to vector<8x128xf32>
    %22 = arith.select %20, %21, %18 : vector<8x128xi1>, vector<8x128xf32>
    %c127_i32 = arith.constant 127 : i32
    %23 = tpu.dynamic_rotate %7 by %c127_i32 dim 1 : vector<8x128xf32>, i32 -> vector<8x128xf32>
    %c127_i32_12 = arith.constant 127 : i32
    %24 = vector.broadcast %c127_i32_12 : i32 to vector<8x128xi32>
    %25 = arith.cmpi sge, %0, %24 : vector<8x128xi32>
    %cst_13 = arith.constant 0.000000e+00 : f32
    %26 = vector.broadcast %cst_13 : f32 to vector<8x128xf32>
    %27 = arith.select %25, %26, %23 : vector<8x128xi1>, vector<8x128xf32>
    %28 = tpu.concatenate %12, %17, %7, %22, %27 in 0 : vector<8x128xf32>, vector<8x128xf32>, vector<8x128xf32>, vector<8x128xf32>, vector<8x128xf32> -> vector<40x128xf32>
    %c0_14 = arith.constant 0 : index
    %c0_15 = arith.constant 0 : index
    %c0_16 = arith.constant 0 : index
    %29 = vector.load %arg4[%c0_14, %c0_15, %c0_16] : memref<4x8x40xbf16, #tpu.memory_space<vmem>>, vector<1x8x40xbf16>
    %30 = vector.shape_cast %29 : vector<1x8x40xbf16> to vector<8x40xbf16>
    %31 = arith.truncf %28 : vector<40x128xf32> to vector<40x128xbf16>
    %cst_17 = arith.constant dense<0.000000e+00> : vector<8x128xf32>
    %32 = tpu.matmul %30, %31, %cst_17 {dimension_numbers = #tpu.dot_dimension_numbers<[1], [0], [0], [1], [0, 0, 1, 1], [], []>} : vector<8x40xbf16>, vector<40x128xbf16>, vector<8x128xf32> -> vector<8x128xf32>
    %c0_18 = arith.constant 0 : index
    %c0_19 = arith.constant 0 : index
    %c0_20 = arith.constant 0 : index
    %33 = vector.load %arg5[%c0_18, %c0_19, %c0_20] : memref<4x8x1xf32, #tpu.memory_space<vmem>>, vector<1x8x1xf32>
    %34 = vector.shape_cast %33 : vector<1x8x1xf32> to vector<8x1xf32>
    %35 = vector.broadcast %34 : vector<8x1xf32> to vector<8x128xf32>
    %36 = arith.addf %32, %35 : vector<8x128xf32>
    %cst_21 = arith.constant 0.000000e+00 : f32
    %37 = vector.broadcast %cst_21 : f32 to vector<8x128xf32>
    %38 = arith.maximumf %36, %37 : vector<8x128xf32>
    %39 = arith.addf %38, %7 : vector<8x128xf32>
    %c4_i32 = arith.constant 4 : i32
    %40 = tpu.dynamic_rotate %39 by %c4_i32 dim 1 : vector<8x128xf32>, i32 -> vector<8x128xf32>
    %c4_i32_22 = arith.constant 4 : i32
    %41 = vector.broadcast %c4_i32_22 : i32 to vector<8x128xi32>
    %42 = arith.cmpi slt, %0, %41 : vector<8x128xi32>
    %cst_23 = arith.constant 0.000000e+00 : f32
    %43 = vector.broadcast %cst_23 : f32 to vector<8x128xf32>
    %44 = arith.select %42, %43, %40 : vector<8x128xi1>, vector<8x128xf32>
    %c124_i32 = arith.constant 124 : i32
    %45 = tpu.dynamic_rotate %39 by %c124_i32 dim 1 : vector<8x128xf32>, i32 -> vector<8x128xf32>
    %c124_i32_24 = arith.constant 124 : i32
    %46 = vector.broadcast %c124_i32_24 : i32 to vector<8x128xi32>
    %47 = arith.cmpi sge, %0, %46 : vector<8x128xi32>
    %cst_25 = arith.constant 0.000000e+00 : f32
    %48 = vector.broadcast %cst_25 : f32 to vector<8x128xf32>
    %49 = arith.select %47, %48, %45 : vector<8x128xi1>, vector<8x128xf32>
    %c2_i32 = arith.constant 2 : i32
    %50 = tpu.dynamic_rotate %39 by %c2_i32 dim 1 : vector<8x128xf32>, i32 -> vector<8x128xf32>
    %c2_i32_26 = arith.constant 2 : i32
    %51 = vector.broadcast %c2_i32_26 : i32 to vector<8x128xi32>
    %52 = arith.cmpi slt, %0, %51 : vector<8x128xi32>
    %cst_27 = arith.constant 0.000000e+00 : f32
    %53 = vector.broadcast %cst_27 : f32 to vector<8x128xf32>
    %54 = arith.select %52, %53, %50 : vector<8x128xi1>, vector<8x128xf32>
    %c126_i32 = arith.constant 126 : i32
    %55 = tpu.dynamic_rotate %39 by %c126_i32 dim 1 : vector<8x128xf32>, i32 -> vector<8x128xf32>
    %c126_i32_28 = arith.constant 126 : i32
    %56 = vector.broadcast %c126_i32_28 : i32 to vector<8x128xi32>
    %57 = arith.cmpi sge, %0, %56 : vector<8x128xi32>
    %cst_29 = arith.constant 0.000000e+00 : f32
    %58 = vector.broadcast %cst_29 : f32 to vector<8x128xf32>
    %59 = arith.select %57, %58, %55 : vector<8x128xi1>, vector<8x128xf32>
    %60 = tpu.concatenate %44, %49, %39, %54, %59 in 0 : vector<8x128xf32>, vector<8x128xf32>, vector<8x128xf32>, vector<8x128xf32>, vector<8x128xf32> -> vector<40x128xf32>
    %c1 = arith.constant 1 : index
    %c0_30 = arith.constant 0 : index
    %c0_31 = arith.constant 0 : index
    %61 = vector.load %arg4[%c1, %c0_30, %c0_31] : memref<4x8x40xbf16, #tpu.memory_space<vmem>>, vector<1x8x40xbf16>
    %62 = vector.shape_cast %61 : vector<1x8x40xbf16> to vector<8x40xbf16>
    %63 = arith.truncf %60 : vector<40x128xf32> to vector<40x128xbf16>
    %cst_32 = arith.constant dense<0.000000e+00> : vector<8x128xf32>
    %64 = tpu.matmul %62, %63, %cst_32 {dimension_numbers = #tpu.dot_dimension_numbers<[1], [0], [0], [1], [0, 0, 1, 1], [], []>} : vector<8x40xbf16>, vector<40x128xbf16>, vector<8x128xf32> -> vector<8x128xf32>
    %c1_33 = arith.constant 1 : index
    %c0_34 = arith.constant 0 : index
    %c0_35 = arith.constant 0 : index
    %65 = vector.load %arg5[%c1_33, %c0_34, %c0_35] : memref<4x8x1xf32, #tpu.memory_space<vmem>>, vector<1x8x1xf32>
    %66 = vector.shape_cast %65 : vector<1x8x1xf32> to vector<8x1xf32>
    %67 = vector.broadcast %66 : vector<8x1xf32> to vector<8x128xf32>
    %68 = arith.addf %64, %67 : vector<8x128xf32>
    %cst_36 = arith.constant 0.000000e+00 : f32
    %69 = vector.broadcast %cst_36 : f32 to vector<8x128xf32>
    %70 = arith.maximumf %68, %69 : vector<8x128xf32>
    %71 = arith.addf %70, %39 : vector<8x128xf32>
    %c2_i32_37 = arith.constant 2 : i32
    %72 = tpu.dynamic_rotate %71 by %c2_i32_37 dim 1 : vector<8x128xf32>, i32 -> vector<8x128xf32>
    %c2_i32_38 = arith.constant 2 : i32
    %73 = vector.broadcast %c2_i32_38 : i32 to vector<8x128xi32>
    %74 = arith.cmpi slt, %0, %73 : vector<8x128xi32>
    %cst_39 = arith.constant 0.000000e+00 : f32
    %75 = vector.broadcast %cst_39 : f32 to vector<8x128xf32>
    %76 = arith.select %74, %75, %72 : vector<8x128xi1>, vector<8x128xf32>
    %c126_i32_40 = arith.constant 126 : i32
    %77 = tpu.dynamic_rotate %71 by %c126_i32_40 dim 1 : vector<8x128xf32>, i32 -> vector<8x128xf32>
    %c126_i32_41 = arith.constant 126 : i32
    %78 = vector.broadcast %c126_i32_41 : i32 to vector<8x128xi32>
    %79 = arith.cmpi sge, %0, %78 : vector<8x128xi32>
    %cst_42 = arith.constant 0.000000e+00 : f32
    %80 = vector.broadcast %cst_42 : f32 to vector<8x128xf32>
    %81 = arith.select %79, %80, %77 : vector<8x128xi1>, vector<8x128xf32>
    %c4_i32_43 = arith.constant 4 : i32
    %82 = tpu.dynamic_rotate %71 by %c4_i32_43 dim 1 : vector<8x128xf32>, i32 -> vector<8x128xf32>
    %c4_i32_44 = arith.constant 4 : i32
    %83 = vector.broadcast %c4_i32_44 : i32 to vector<8x128xi32>
    %84 = arith.cmpi slt, %0, %83 : vector<8x128xi32>
    %cst_45 = arith.constant 0.000000e+00 : f32
    %85 = vector.broadcast %cst_45 : f32 to vector<8x128xf32>
    %86 = arith.select %84, %85, %82 : vector<8x128xi1>, vector<8x128xf32>
    %c124_i32_46 = arith.constant 124 : i32
    %87 = tpu.dynamic_rotate %71 by %c124_i32_46 dim 1 : vector<8x128xf32>, i32 -> vector<8x128xf32>
    %c124_i32_47 = arith.constant 124 : i32
    %88 = vector.broadcast %c124_i32_47 : i32 to vector<8x128xi32>
    %89 = arith.cmpi sge, %0, %88 : vector<8x128xi32>
    %cst_48 = arith.constant 0.000000e+00 : f32
    %90 = vector.broadcast %cst_48 : f32 to vector<8x128xf32>
    %91 = arith.select %89, %90, %87 : vector<8x128xi1>, vector<8x128xf32>
    %92 = tpu.concatenate %76, %81, %71, %86, %91 in 0 : vector<8x128xf32>, vector<8x128xf32>, vector<8x128xf32>, vector<8x128xf32>, vector<8x128xf32> -> vector<40x128xf32>
    %c2 = arith.constant 2 : index
    %c0_49 = arith.constant 0 : index
    %c0_50 = arith.constant 0 : index
    %93 = vector.load %arg4[%c2, %c0_49, %c0_50] : memref<4x8x40xbf16, #tpu.memory_space<vmem>>, vector<1x8x40xbf16>
    %94 = vector.shape_cast %93 : vector<1x8x40xbf16> to vector<8x40xbf16>
    %95 = arith.truncf %92 : vector<40x128xf32> to vector<40x128xbf16>
    %cst_51 = arith.constant dense<0.000000e+00> : vector<8x128xf32>
    %96 = tpu.matmul %94, %95, %cst_51 {dimension_numbers = #tpu.dot_dimension_numbers<[1], [0], [0], [1], [0, 0, 1, 1], [], []>} : vector<8x40xbf16>, vector<40x128xbf16>, vector<8x128xf32> -> vector<8x128xf32>
    %c2_52 = arith.constant 2 : index
    %c0_53 = arith.constant 0 : index
    %c0_54 = arith.constant 0 : index
    %97 = vector.load %arg5[%c2_52, %c0_53, %c0_54] : memref<4x8x1xf32, #tpu.memory_space<vmem>>, vector<1x8x1xf32>
    %98 = vector.shape_cast %97 : vector<1x8x1xf32> to vector<8x1xf32>
    %99 = vector.broadcast %98 : vector<8x1xf32> to vector<8x128xf32>
    %100 = arith.addf %96, %99 : vector<8x128xf32>
    %cst_55 = arith.constant 0.000000e+00 : f32
    %101 = vector.broadcast %cst_55 : f32 to vector<8x128xf32>
    %102 = arith.maximumf %100, %101 : vector<8x128xf32>
    %103 = arith.addf %102, %71 : vector<8x128xf32>
    %c1_i32_56 = arith.constant 1 : i32
    %104 = tpu.dynamic_rotate %103 by %c1_i32_56 dim 1 : vector<8x128xf32>, i32 -> vector<8x128xf32>
    %c1_i32_57 = arith.constant 1 : i32
    %105 = vector.broadcast %c1_i32_57 : i32 to vector<8x128xi32>
    %106 = arith.cmpi slt, %0, %105 : vector<8x128xi32>
    %cst_58 = arith.constant 0.000000e+00 : f32
    %107 = vector.broadcast %cst_58 : f32 to vector<8x128xf32>
    %108 = arith.select %106, %107, %104 : vector<8x128xi1>, vector<8x128xf32>
    %c127_i32_59 = arith.constant 127 : i32
    %109 = tpu.dynamic_rotate %103 by %c127_i32_59 dim 1 : vector<8x128xf32>, i32 -> vector<8x128xf32>
    %c127_i32_60 = arith.constant 127 : i32
    %110 = vector.broadcast %c127_i32_60 : i32 to vector<8x128xi32>
    %111 = arith.cmpi sge, %0, %110 : vector<8x128xi32>
    %cst_61 = arith.constant 0.000000e+00 : f32
    %112 = vector.broadcast %cst_61 : f32 to vector<8x128xf32>
    %113 = arith.select %111, %112, %109 : vector<8x128xi1>, vector<8x128xf32>
    %c8_i32_62 = arith.constant 8 : i32
    %114 = tpu.dynamic_rotate %103 by %c8_i32_62 dim 1 : vector<8x128xf32>, i32 -> vector<8x128xf32>
    %c8_i32_63 = arith.constant 8 : i32
    %115 = vector.broadcast %c8_i32_63 : i32 to vector<8x128xi32>
    %116 = arith.cmpi slt, %0, %115 : vector<8x128xi32>
    %cst_64 = arith.constant 0.000000e+00 : f32
    %117 = vector.broadcast %cst_64 : f32 to vector<8x128xf32>
    %118 = arith.select %116, %117, %114 : vector<8x128xi1>, vector<8x128xf32>
    %c120_i32_65 = arith.constant 120 : i32
    %119 = tpu.dynamic_rotate %103 by %c120_i32_65 dim 1 : vector<8x128xf32>, i32 -> vector<8x128xf32>
    %c120_i32_66 = arith.constant 120 : i32
    %120 = vector.broadcast %c120_i32_66 : i32 to vector<8x128xi32>
    %121 = arith.cmpi sge, %0, %120 : vector<8x128xi32>
    %cst_67 = arith.constant 0.000000e+00 : f32
    %122 = vector.broadcast %cst_67 : f32 to vector<8x128xf32>
    %123 = arith.select %121, %122, %119 : vector<8x128xi1>, vector<8x128xf32>
    %124 = tpu.concatenate %108, %113, %103, %118, %123 in 0 : vector<8x128xf32>, vector<8x128xf32>, vector<8x128xf32>, vector<8x128xf32>, vector<8x128xf32> -> vector<40x128xf32>
    %c3 = arith.constant 3 : index
    %c0_68 = arith.constant 0 : index
    %c0_69 = arith.constant 0 : index
    %125 = vector.load %arg4[%c3, %c0_68, %c0_69] : memref<4x8x40xbf16, #tpu.memory_space<vmem>>, vector<1x8x40xbf16>
    %126 = vector.shape_cast %125 : vector<1x8x40xbf16> to vector<8x40xbf16>
    %127 = arith.truncf %124 : vector<40x128xf32> to vector<40x128xbf16>
    %cst_70 = arith.constant dense<0.000000e+00> : vector<8x128xf32>
    %128 = tpu.matmul %126, %127, %cst_70 {dimension_numbers = #tpu.dot_dimension_numbers<[1], [0], [0], [1], [0, 0, 1, 1], [], []>} : vector<8x40xbf16>, vector<40x128xbf16>, vector<8x128xf32> -> vector<8x128xf32>
    %c3_71 = arith.constant 3 : index
    %c0_72 = arith.constant 0 : index
    %c0_73 = arith.constant 0 : index
    %129 = vector.load %arg5[%c3_71, %c0_72, %c0_73] : memref<4x8x1xf32, #tpu.memory_space<vmem>>, vector<1x8x1xf32>
    %130 = vector.shape_cast %129 : vector<1x8x1xf32> to vector<8x1xf32>
    %131 = vector.broadcast %130 : vector<8x1xf32> to vector<8x128xf32>
    %132 = arith.addf %128, %131 : vector<8x128xf32>
    %cst_74 = arith.constant 0.000000e+00 : f32
    %133 = vector.broadcast %cst_74 : f32 to vector<8x128xf32>
    %134 = arith.maximumf %132, %133 : vector<8x128xf32>
    %135 = arith.addf %134, %103 : vector<8x128xf32>
    %c0_75 = arith.constant 0 : index
    %c0_76 = arith.constant 0 : index
    %136 = vector.load %arg6[%c0_75, %c0_76] : memref<8x8xbf16, #tpu.memory_space<vmem>>, vector<8x8xbf16>
    %137 = arith.truncf %135 : vector<8x128xf32> to vector<8x128xbf16>
    %cst_77 = arith.constant dense<0.000000e+00> : vector<8x128xf32>
    %138 = tpu.matmul %136, %137, %cst_77 {dimension_numbers = #tpu.dot_dimension_numbers<[1], [0], [0], [1], [0, 0, 1, 1], [], []>} : vector<8x8xbf16>, vector<8x128xbf16>, vector<8x128xf32> -> vector<8x128xf32>
    %c0_78 = arith.constant 0 : index
    %c0_79 = arith.constant 0 : index
    %139 = vector.load %arg7[%c0_78, %c0_79] : memref<8x1xf32, #tpu.memory_space<vmem>>, vector<8x1xf32>
    %140 = vector.broadcast %139 : vector<8x1xf32> to vector<8x128xf32>
    %141 = arith.addf %138, %140 : vector<8x128xf32>
    %c0_80 = arith.constant 0 : index
    %c0_81 = arith.constant 0 : index
    %c0_82 = arith.constant 0 : index
    %142 = vector.load %arg8[%c0_80, %c0_81, %c0_82] : memref<1x8x128xf32, #tpu.memory_space<vmem>>, vector<1x8x128xf32>
    %143 = vector.shape_cast %142 : vector<1x8x128xf32> to vector<8x128xf32>
    %144 = vector.shape_cast %141 : vector<8x128xf32> to vector<1x8x128xf32>
    tpu.vector_store %arg8[%c0_80, %c0_81, %c0_82], %144 {strides = array<i32>} : memref<1x8x128xf32, #tpu.memory_space<vmem>>, vector<1x8x128xf32>,
    return
  }
  func.func @transform_0(%arg0: i32) -> (i32, i32, i32) {
    %c0_i32 = arith.constant 0 : i32
    %c0_i32_0 = arith.constant 0 : i32
    %c0_i32_1 = arith.constant 0 : i32
    return %arg0, %c0_i32, %c0_i32_0 : i32, i32, i32
  }
  func.func @transform_1(%arg0: i32) -> (i32, i32) {
    %c0_i32 = arith.constant 0 : i32
    %c0_i32_0 = arith.constant 0 : i32
    %c0_i32_1 = arith.constant 0 : i32
    return %c0_i32, %c0_i32_0 : i32, i32
  }
  func.func @transform_2(%arg0: i32) -> (i32, i32) {
    %c0_i32 = arith.constant 0 : i32
    %c0_i32_0 = arith.constant 0 : i32
    %c0_i32_1 = arith.constant 0 : i32
    return %c0_i32, %c0_i32_0 : i32, i32
  }
  func.func @transform_3(%arg0: i32) -> (i32, i32, i32) {
    %c0_i32 = arith.constant 0 : i32
    %c0_i32_0 = arith.constant 0 : i32
    %c0_i32_1 = arith.constant 0 : i32
    %c0_i32_2 = arith.constant 0 : i32
    return %c0_i32, %c0_i32_0, %c0_i32_1 : i32, i32, i32
  }
  func.func @transform_4(%arg0: i32) -> (i32, i32, i32) {
    %c0_i32 = arith.constant 0 : i32
    %c0_i32_0 = arith.constant 0 : i32
    %c0_i32_1 = arith.constant 0 : i32
    %c0_i32_2 = arith.constant 0 : i32
    return %c0_i32, %c0_i32_0, %c0_i32_1 : i32, i32, i32
  }
  func.func @transform_5(%arg0: i32) -> (i32, i32) {
    %c0_i32 = arith.constant 0 : i32
    %c0_i32_0 = arith.constant 0 : i32
    %c0_i32_1 = arith.constant 0 : i32
    return %c0_i32, %c0_i32_0 : i32, i32
  }
  func.func @transform_6(%arg0: i32) -> (i32, i32) {
    %c0_i32 = arith.constant 0 : i32
    %c0_i32_0 = arith.constant 0 : i32
    %c0_i32_1 = arith.constant 0 : i32
    return %c0_i32, %c0_i32_0 : i32, i32
  }
  func.func @transform_7(%arg0: i32) -> (i32, i32, i32) {
    %c0_i32 = arith.constant 0 : i32
    %c0_i32_0 = arith.constant 0 : i32
    %c0_i32_1 = arith.constant 0 : i32
    return %arg0, %c0_i32, %c0_i32_0 : i32, i32, i32
  }
}

</mosaic_0001>

<bundles_post_ra>
// kernel: tpu_custom_call.1
= control target key start
LH: loop header
LB: loop body
LE: loop exit
PB: predicated region body
PF: predicated region fallthrough
CT: control target
= control target key end

     0   :  { %12 = vsyncpa [#allocation3], 0  ;;  %s1019_s0 = inlined_call_operand.vmem [shape: bf16[2,8,128], index: 0, kind: input, shape index: {}]   ;;  %s1020_s1 = inlined_call_operand.vmem [shape: bf16[8,8], index: 1, kind: input, shape index: {}]   ;;  %s1021_s2 = inlined_call_operand.vmem [shape: f32[8,1], index: 2, kind: input, shape index: {}]   ;;  %s1022_s3 = inlined_call_operand.vmem [shape: bf16[4,8,40], index: 3, kind: input, shape index: {}]   ;;  %s1023_s4 = inlined_call_operand.vmem [shape: f32[4,8,1], index: 4, kind: input, shape index: {}]   ;;  %s1024_s5 = inlined_call_operand.vmem [shape: bf16[8,8], index: 5, kind: input, shape index: {}]   ;;  %s1025_s6 = inlined_call_operand.vmem [shape: f32[8,1], index: 6, kind: input, shape index: {}]   ;;  %s1026_s7 = inlined_call_operand.hbm [shape: f32[2,8,128], index: 7, kind: output, shape index: {}]  }
   0x1   :  { %14 = vsyncpa [#allocation3 + $0x1], 0  ;;  %s824_s24 = smov 0   ;;  %s826_s25 = smov 0  }
   0x2   :  { %s828_s26 = smov 0   ;;  %s830_s27 = smov 0  }
   0x3 LB: > { %s845_s28 = sadd.s32 4294967295, %s772_s27   ;;  %s596_s29 = sadd.s32 4294967294, %s772_s27   ;;  %s772_s27 = sphi %s830_s27, %s1032_s27   ;;  %s768_s26 = sphi %s828_s26, %s1031_s26   ;;  %s764_s25 = sphi %s826_s25, %s1030_s25   ;;  %s760_s24 = sphi %s824_s24, %s1029_s24  }
   0x4   : > { %s849_s30 = sadd.s32 1, %s772_s27   ;;  %s179_s8 = sadd.s32 1, %s768_s26 }
   0x5   : > { %s176_s9 = ssub.s32 %s772_s27, %s849_s30  ;;  %p189_p0 = scmp.ne.s32.totalorder %s768_s26, %s764_s25 }
   0x6   : > { %p177_p1 = scmp.eq.s32.totalorder %s176_s9, 0  ;;  %p190_p2 = scmp.eq.s32.totalorder %s845_s28, 1 }
   0x7   : > { %p195_p3 = scmp.ne.s32.totalorder %s764_s25, %s760_s24  ;;  %p196_p4 = scmp.eq.s32.totalorder %s596_s29, 1 }
   0x8   : > { %s860_s10 = scalar_select %p177_p1, %s768_s26, %s179_s8  }
   0x9   : > { %p862_p5 = por %p190_p2, %p189_p0  ;;  %p866_p6 = por %p196_p4, %p195_p3 }
   0xa   : > { %p599_p7 = scmp.ge.s32.totalorder %s772_s27, 1  ;;  %p239_p8 = scmp.lt.s32.totalorder %s772_s27, 3 }
   0xc   : > { %p240_p9 = pnand %p599_p7, %p239_p8 }
   0xd   : > { %p270_p10 = scmp.lt.s32.totalorder (!%p240_p9), %s845_s28, 1  ;;  %s775_s22 = smov (!%p240_p9), 120  }
   0xe   : > { %243 = sbr.rel (%p240_p9) target bundleno = 1353 (0x549), region = 48  ;;  %s776_s23 = smov (!%p240_p9), 1  }
   0xf   : > { %s777_s29 = smov (!%p240_p9), 127   ;;  %s778_s8 = smov (!%p240_p9), 8  }
  0x10   : > { %s781_s17 = smov (!%p240_p9), 2   ;;  %s782_s18 = smov (!%p240_p9), 126  }
  0x11   : > { %s267_s9 = sand.u32 (!%p240_p9), 1, %s764_s25   ;;  %s651_s13 = sshll.u32 (!%p240_p9), %s845_s28, 3 }
  0x12   : > { %s600_s14 = sshll.u32 (!%p240_p9), %s267_s9, 3  ;;  %s522_s21 = scalar_lea.sflag (!%p240_p9), [#allocation3], %s267_s9 }
  0x13   : > { %v774_v0 = vmov 0   ;;  %v279_v1 = vld [vmem:[%s1021_s2] sm:$0xff]  ;;  %s271_s15 = scalar_select %p270_p10, %s845_s28, 1  ;;  %vm289_vm0 = vcmask 1043456   ;;  %vm285_vm1 = vcmask 64512   ;;  %v275_v10 = vlaneseq  ;;  %v614_v28 = vld [vmem:[%s1023_s4 + $0x8] sm:$0xff] }
  0x14   : > { %707 = vset.pattern.permute.xlu0 %v774_v0  ;;  %708 = vset.pattern.permute.xlu2 %v774_v0  ;;  %v278_v4 = vld [vmem:[%s1020_s1] sm:$0xf]  ;;  %vm779_vm5 = vmmov 1   ;;  %vm332_vm10 = vcmask 326656   ;;  %v613_v38 = vld [vmem:[%s1022_s3 + $0x4] sm:$0xf] }
  0x15   : > { %282 = vperm.xlu0 %707, %v279_v1   ;;  %709 = vset.pattern.permute.xlu1 %v774_v0  ;;  %s601_s16 = sshll.u32 %s271_s15, 2  ;;  %v326_v9 = vld [vmem:[%s1023_s4] sm:$0xff]  ;;  %v892_v11 = vand.u32 127, %v275_v10  ;;  %v626_v45 = vld [vmem:[%s1023_s4 + $0x10] sm:$0xff]  ;;  %v625_v55 = vld [vmem:[%s1022_s3 + $0x8] sm:$0xf] }
  0x16   : > { %s273_s19 = scalar_lea.vmem %s1019_s0, %s601_s16  ;;  %v322_v21 = vld [vmem:[%s1022_s3] sm:$0xf]  ;;  %s780_s16 = smov 4   ;;  %v638_v63 = vld [vmem:[%s1023_s4 + $0x18] sm:$0xff] }
  0x17   : > { %v277_v2 = vld [vmem:[%s273_s19] sm:$0xf]  ;;  %vm320_vm2 = vcmp.ge.s32.totalorder %v892_v11, 127  ;;  %vm654_vm3 = vcmp.ge.s32.totalorder %v892_v11, 1  ;;  %vm312_vm4 = vcmp.ge.s32.totalorder %v892_v11, 120  ;;  %vm655_vm8 = vcmp.ge.s32.totalorder %v892_v11, 8 }
  0x18   : > { %v291_v3 = vsel %vm289_vm0, %v277_v2, 0  ;;  %vm604_vm6 = vmpackc.low %vm654_vm3, %vm779_vm5  ;;  %s783_s19 = smov 124   ;;  %vm368_vm11 = vcmp.ge.s32.totalorder %v892_v11, 126  ;;  %vm656_vm12 = vcmp.ge.s32.totalorder %v892_v11, 2  ;;  %vm360_vm13 = vcmp.ge.s32.totalorder %v892_v11, 124  ;;  %v495_v62 = vld [vmem:[%s1025_s6] sm:$0xff] }
  0x19   : > { %300 = vmatpush.bf16.msra.mxu0 %v291_v3  ;;  %vm607_vm7 = vmneg %vm312_vm4 }
  0x1a   : > { %vm609_vm9 = vmpackc.low %vm607_vm7, %vm655_vm8 }
  0x1b   : > { %vm616_vm14 = vmpackc.low %vm656_vm12, %vm779_vm5 }
  0x1c   : > { %602 = vmatmul.msk.bf16.vlgmr.msra.gmra.mxu0 %vm285_vm1, %v278_v4  ;;  %vm619_vm15 = vmneg %vm360_vm13 }
  0x87   : > { %v283_v5 = vpop.permute.xlu0 %282 }
  0x99   : > { %v302_v6 = vpop.f32.mrf.mxu0 }
  0x9a   : > { %v303_v7 = vadd.f32 %v302_v6, %v283_v5 }
  0x9c   : > { %310 = vrot.lane.b32.xlu2 %v303_v7, %s775_s22  ;;  %314 = vrot.lane.b32.xlu1 %v303_v7, %s776_s23 }
  0x9d   : > { %318 = vrot.lane.b32.xlu0 %v303_v7, %s777_s29 }
  0xa1   : > { %v304_v8 = vpop.f32.mrf.mxu0 }
  0xa4   : > { %306 = vrot.lane.b32.xlu1 %v303_v7, %s778_s8  ;;  %329 = vperm.xlu2 %708, %v326_v9   ;;  %v637_v9 = vld [vmem:[%s1022_s3 + $0xc] sm:$0xf] }
  0xf6   : > { %v311_v19 = vpop.permute.xlu2 %310 }
  0xfe   : > { %v330_v22 = vpop.permute.xlu2 %329 }
 0x10e   : > { %v315_v12 = vpop.permute.xlu1 %314 }
 0x10f   : > { %v319_v13 = vpop.permute.xlu0 %318  ;;  %v605_v17 = vpack.c.bf16 %v315_v12, %v303_v7 }
 0x110   : > { %v321_v14 = vsel %vm320_vm2, 0.0, %v319_v13 }
 0x111   : > { %v325_v15 = vpack.c.bf16 %v321_v14, %v321_v14 }
 0x113   : > { %v337_v16 = vsel %vm289_vm0, %v325_v15, 0 }
 0x114   : > { %344 = vmatpush.bf16.msra.mxu1 %v337_v16 }
 0x116   : > { %v307_v18 = vpop.permute.xlu1 %306 }
 0x117   : > { %v610_v20 = vpack.c.bf16 %v311_v19, %v307_v18  ;;  %v493_v18 = vld [vmem:[%s1024_s5] sm:$0xf] }
 0x118   : > { %606 = vmatpush.bf16.msk.msra.mxu1 %vm604_vm6, %v605_v17  ;;  %vm657_vm6 = vcmp.ge.s32.totalorder %v892_v11, 4 }
 0x119   : > { %vm621_vm7 = vmpackc.low %vm619_vm15, %vm657_vm6 }
 0x11c   : > { %611 = vmatpush.bf16.msk.msra.mxu1 %vm609_vm9, %v610_v20  ;;  %vm628_vm9 = vmpackc.low %vm657_vm6, %vm779_vm5 }
 0x11f   : > { %612 = vmatmul.msk.bf16.vlgmr.msra.gmra.mxu1 %vm332_vm10, %v322_v21 }
 0x19c   : > { %v348_v23 = vpop.f32.mrf.mxu1 }
 0x19d   : > { %v349_v24 = vadd.f32 %v348_v23, %v330_v22 }
 0x19f   : > { %v352_v25 = vmax.f32 %v349_v24, 0.0 }
 0x1a1   : > { %v353_v26 = vadd.f32 %v352_v25, %v303_v7 }
 0x1a3   : > { %354 = vrot.lane.b32.xlu2 %v353_v26, %s780_s16  ;;  %362 = vrot.lane.b32.xlu1 %v353_v26, %s781_s17 }
 0x1a4   : > { %366 = vrot.lane.b32.xlu0 %v353_v26, %s782_s18  ;;  %v350_v27 = vpop.f32.mrf.mxu1 }
 0x1ab   : > { %379 = vperm.xlu1 %709, %v614_v28  }
 0x1ac   : > { %358 = vrot.lane.b32.xlu0 %v353_v26, %s783_s19 }
 0x1fd   : > { %v355_v36 = vpop.permute.xlu2 %354 }
 0x215   : > { %v363_v32 = vpop.permute.xlu1 %362 }
 0x216   : > { %v367_v29 = vpop.permute.xlu0 %366  ;;  %v617_v34 = vpack.c.bf16 %v363_v32, %v353_v26 }
 0x217   : > { %v369_v30 = vsel %vm368_vm11, 0.0, %v367_v29 }
 0x218   : > { %v374_v31 = vpack.c.bf16 %v369_v30, %v369_v30 }
 0x21a   : > { %v386_v33 = vsel %vm289_vm0, %v374_v31, 0 }
 0x21b   : > { %393 = vmatpush.bf16.msra.mxu2 %v386_v33 }
 0x21d   : > { %v380_v39 = vpop.permute.xlu1 %379 }
 0x21e   : > { %v359_v35 = vpop.permute.xlu0 %358 }
 0x21f   : > { %618 = vmatpush.bf16.msk.msra.mxu2 %vm616_vm14, %v617_v34  ;;  %v622_v37 = vpack.c.bf16 %v359_v35, %v355_v36  ;;  %vm631_vm14 = vmneg %vm368_vm11 }
 0x220   : > { %vm633_vm15 = vmpackc.low %vm631_vm14, %vm656_vm12 }
 0x221   : > { %vm640_vm11 = vmpackc.low %vm655_vm8, %vm779_vm5 }
 0x222   : > { %vm643_vm12 = vmneg %vm320_vm2 }
 0x223   : > { %623 = vmatpush.bf16.msk.msra.mxu2 %vm621_vm7, %v622_v37 }
 0x226   : > { %624 = vmatmul.msk.bf16.vlgmr.msra.gmra.mxu2 %vm332_vm10, %v613_v38 }
 0x2a9   : > { %v397_v40 = vpop.f32.mrf.mxu2 }
 0x2aa   : > { %v398_v41 = vadd.f32 %v397_v40, %v380_v39 }
 0x2ac   : > { %v401_v42 = vmax.f32 %v398_v41, 0.0 }
 0x2ae   : > { %v402_v43 = vadd.f32 %v401_v42, %v353_v26 }
 0x2b0   : > { %403 = vrot.lane.b32.xlu1 %v402_v43, %s781_s17  ;;  %409 = vrot.lane.b32.xlu0 %v402_v43, %s780_s16  ;;  %s532_s17 = scalar_lea.hbm %s1026_s7, %s651_s13 }
 0x2b1   : > { %412 = vrot.lane.b32.xlu2 %v402_v43, %s783_s19  ;;  %v399_v44 = vpop.f32.mrf.mxu2  ;;  %s536_s20 = sshll.u32 %s532_s17, 4  ;;  %s537_s20 = int_to_ptr.hbm [resolvable:$true] %s536_s20 }
 0x2b8   : > { %424 = vperm.xlu0 %707, %v626_v45  }
 0x2b9   : > { %406 = vrot.lane.b32.xlu2 %v402_v43, %s782_s18  ;;  %s269_s18 = scalar_lea.vmem [#allocation2], %s600_s14 }
 0x2ba   : > { %s534_s19 = sshll.u32 %s269_s18, 4  ;;  %s535_s19 = int_to_ptr.vmem [resolvable:$true] %s534_s19 }
 0x30b   : > { %v413_v46 = vpop.permute.xlu2 %412 }
 0x30c   : > { %v414_v47 = vsel %vm360_vm13, 0.0, %v413_v46  ;;  %vm645_vm13 = vmpackc.low %vm643_vm12, %vm654_vm3 }
 0x30d   : > { %v419_v48 = vpack.c.bf16 %v414_v47, %v414_v47 }
 0x30f   : > { %v431_v49 = vsel %vm289_vm0, %v419_v48, 0 }
 0x310   : > { %438 = vmatpush.bf16.msra.mxu3 %v431_v49 }
 0x313   : > { %v407_v53 = vpop.permute.xlu2 %406 }
 0x322   : > { %v410_v50 = vpop.permute.xlu0 %409  ;;  %v404_v52 = vpop.permute.xlu1 %403 }
 0x323   : > { %v629_v51 = vpack.c.bf16 %v410_v50, %v402_v43  ;;  %v634_v54 = vpack.c.bf16 %v407_v53, %v404_v52 }
 0x325   : > { %630 = vmatpush.bf16.msk.msra.mxu3 %vm628_vm9, %v629_v51 }
 0x329   : > { %635 = vmatpush.bf16.msk.msra.mxu3 %vm633_vm15, %v634_v54 }
 0x32a   : > { %v425_v56 = vpop.permute.xlu0 %424 }
 0x32c   : > { %636 = vmatmul.msk.bf16.vlgmr.msra.gmra.mxu3 %vm332_vm10, %v625_v55 }
 0x3af   : > { %v442_v57 = vpop.f32.mrf.mxu3 }
 0x3b0   : > { %v443_v58 = vadd.f32 %v442_v57, %v425_v56 }
 0x3b2   : > { %v446_v59 = vmax.f32 %v443_v58, 0.0 }
 0x3b4   : > { %v447_v60 = vadd.f32 %v446_v59, %v402_v43 }
 0x3b6   : > { %448 = vrot.lane.b32.xlu0 %v447_v60, %s776_s23  ;;  %454 = vrot.lane.b32.xlu2 %v447_v60, %s778_s8  ;;  %s730_s8 = scalar_lea.hbm %s1026_s7, 16 }
 0x3b7   : > { %457 = vrot.lane.b32.xlu1 %v447_v60, %s775_s22  ;;  %v444_v61 = vpop.f32.mrf.mxu3  ;;  %s724_s22 = sshra.s32 %s537_s20, 4  ;;  %s725_s22 = int_to_ptr.hbm [resolvable:$true] %s724_s22 }
 0x3b8   : > { %s726_s23 = scalar_lea.hbm %s725_s22, 8  ;;  %p731_p0 = scmp.lt.s32.totalorder %s725_s22, %s1026_s7 }
 0x3b9   : > { %p727_p11 = scmp.ne.s32.totalorder %s725_s22, %s726_s23  ;;  %p732_p1 = scmp.lt.s32.totalorder %s730_s8, %s726_s23 }
 0x3bb   : > { %p728_p12 = pnand %p727_p11, %p862_p5  ;;  %p733_p2 = por %p732_p1, %p731_p0 }
 0x3bd   : > { %p729_p13 = pneg %p728_p12 }
 0x3be   : > { %498 = vperm.xlu0 %707, %v495_v62   ;;  %469 = vperm.xlu2 %708, %v638_v63  }
 0x3bf   : > { %451 = vrot.lane.b32.xlu1 %v447_v60, %s777_s29  ;;  %p734_p3 = pnand %p733_p2, %p729_p13 }
 0x410   : > { %v455_v3 = vpop.permute.xlu2 %454 }
 0x411   : > { %v641_v5 = vpack.c.bf16 %v455_v3, %v447_v60 }
 0x418   : > { %v470_v10 = vpop.permute.xlu2 %469 }
 0x428   : > { %v449_v7 = vpop.permute.xlu0 %448 }
 0x429   : > { %v458_v0 = vpop.permute.xlu1 %457 }
 0x42a   : > { %v459_v1 = vsel %vm312_vm4, 0.0, %v458_v0 }
 0x42b   : > { %v464_v2 = vpack.c.bf16 %v459_v1, %v459_v1 }
 0x42d   : > { %v476_v4 = vsel %vm289_vm0, %v464_v2, 0 }
 0x42e   : > { %483 = vmatpush.bf16.msrb.mxu0 %v476_v4 }
 0x430   : > { %v499_v19 = vpop.permute.xlu0 %498 }
 0x431   : > { %v452_v6 = vpop.permute.xlu1 %451 }
 0x432   : > { %642 = vmatpush.bf16.msk.msrb.mxu0 %vm640_vm11, %v641_v5  ;;  %v646_v8 = vpack.c.bf16 %v452_v6, %v449_v7 }
 0x436   : > { %647 = vmatpush.bf16.msk.msrb.mxu0 %vm645_vm13, %v646_v8 }
 0x439   : > { %648 = vmatmul.msk.bf16.vlgmr.msrb.gmra.mxu0 %vm332_vm10, %v637_v9 }
 0x4b6   : > { %v487_v12 = vpop.f32.mrf.mxu0 }
 0x4b7   : > { %v488_v13 = vadd.f32 %v487_v12, %v470_v10 }
 0x4b9   : > { %v491_v14 = vmax.f32 %v488_v13, 0.0 }
 0x4bb   : > { %v492_v15 = vadd.f32 %v491_v14, %v447_v60 }
 0x4bd   : > { %v494_v16 = vpack.c.bf16 %v492_v15, %v492_v15 }
 0x4be   : > { %v489_v17 = vpop.f32.mrf.mxu0 }
 0x4bf   : > { %v505_v11 = vsel %vm289_vm0, %v494_v16, 0 }
 0x4c0   : > { %514 = vmatpush.bf16.msrb.mxu1 %v505_v11 }
 0x4c3   : > { %649 = vmatmul.msk.bf16.vlgmr.msrb.gmra.mxu1 %vm285_vm1, %v493_v18 }
 0x540   : > { %v516_v20 = vpop.f32.mrf.mxu1 }
 0x541   : > { %v517_v21 = vadd.f32 %v516_v20, %v499_v19 }
 0x543   : > { %520 = vst [vmem:[%s269_s18] sm:$0xff] %v517_v21 }
 0x544   : > { %737 = shalt.err (!%p734_p3)
}
 0x545   : > { %658 = dma.vmem_to_hbm [thread:$0]  (%p862_p5), %s535_s19, 128, %s537_s20, %s522_s21  }
 0x548   : > { %v518_v22 = vpop.f32.mrf.mxu1 }
 0x549 PF: > { %p664_p4 = scmp.ge.s32.totalorder %s772_s27, 2  ;;  %s548_s9 = sand.u32 1, %s760_s24  }
 0x54a   : > { %s549_s15 = scalar_lea.sflag [#allocation3], %s548_s9 }
 0x54b   : > { %p661_p7 = pnand %p664_p4, %p866_p6 }
 0x54d   : > { %p662_p8 = pneg %p661_p7 }
 0x54f   : > { %755 = dma.done.wait (%p662_p8), %s549_s15, 128  }
 0x550   : > { %757 = vsyncadd (%p662_p8), %s549_s15, 4294967168  ;;  %p17_p9 = scmp.ge.s32.totalorder %s849_s30, 4   ;;  %s1029_s24 = smov %s764_s25 }
 0x551   : > { %s1030_s25 = smov %s768_s26  ;;  %s1031_s26 = smov %s860_s10 }
 0x552   : > { %s1032_s27 = smov %s849_s30  ;;  %19 = sbr.rel (!%p17_p9) target bundleno = 3 (0x3), region = 89 }
 0x557   :  { %555 = vsyncpa [#allocation3], 1 }
 0x558   :  { %557 = vsyncpa [#allocation3 + $0x1], 1 }

</bundles_post_ra>
